<compile_context>
chip_gen: v7x
topology: tpu7x:2x2x1
jax: 0.10.0
libtpu: 0.0.40
codegen_flags: <defaults>
</compile_context>

<pallas_src>
import numpy as np
import jax
import jax.numpy as jnp
from jax.experimental import pallas as pl

# ---- module hyper-parameters (TempDisentangler.__init__) ----
KERNELS = [1, 2, 4]          # kernels
INPUT_DIMS = 4               # input_dims
OUTPUT_DIMS = 8              # output_dims
COMPONENT_DIMS = OUTPUT_DIMS // 2
LENGTH = 16                  # length == T
HIDDEN_DIMS = 32             # input_fc is never used in forward()
DROPOUT = 0.1                # repr_dropout: identity at inference

_HI = jax.lax.Precision.HIGHEST   # keep the all-f32 path f32-accurate


def _dft_matrices(T):
    """Static real/imag rfft (F, T) and irfft (T, F) matrices for fixed T (numpy, host)."""
    F = T // 2 + 1
    f = np.arange(F, dtype=np.float64)
    s = np.arange(T, dtype=np.float64)
    ang = 2.0 * np.pi * np.outer(f, s) / T            # (F, T)
    Dr = np.cos(ang)                                   # rfft real part
    Di = -np.sin(ang)                                  # rfft imag part
    c = np.full((F,), 2.0)
    c[0] = 1.0
    if T % 2 == 0:
        c[-1] = 1.0                                    # Nyquist counted once
    ang_t = 2.0 * np.pi * np.outer(s, f) / T           # (T, F)
    Ir = (c[None, :] / T) * np.cos(ang_t)              # irfft coefficient on Re
    Ii = -(c[None, :] / T) * np.sin(ang_t)             # irfft coefficient on Im
    return (Dr.astype(np.float32), Di.astype(np.float32),
            Ir.astype(np.float32), Ii.astype(np.float32))


def fold_params(params, kernels=KERNELS, T=LENGTH):
    """Fold all module weights into one (C_in*T, 2*T*C_out) operator + (1, 2*T*C_out) bias."""
    conv_w = params["conv_w"]                          # list of (C_out, C_in, k)
    conv_b = params["conv_b"]                          # list of (C_out,)
    C_out, C_in, _ = conv_w[0].shape
    num_k = len(kernels)
    n_out = T * C_out

    # ---- trend path: mean of causal Conv1d branches (mean + bias folded in) ----
    op_trend = jnp.zeros((C_in, T, T, C_out), jnp.float32)   # index [i, s, t, o]
    for k, w in zip(kernels, conv_w):
        for j in range(k):
            d = (k - 1) - j                                   # output t reads input s = t - d
            shift = np.eye(T, T, k=d, dtype=np.float32)       # shift[s, t] = [t == s + d]
            op_trend = op_trend + jnp.einsum("st,oi->isto", shift, w[:, :, j])
    op_trend = op_trend / float(num_k)
    bias_trend = sum(conv_b) / float(num_k)                   # (C_out,)
    bias_trend = jnp.broadcast_to(bias_trend[None, :], (T, C_out))

    # ---- season path: rfft -> per-frequency complex matmul -> irfft, fully folded ----
    Dr, Di, Ir, Ii = _dft_matrices(T)
    Wr = jnp.real(params["four_w"]).astype(jnp.float32)       # (F, C_in, C_out)
    Wi = jnp.imag(params["four_w"]).astype(jnp.float32)
    br = jnp.real(params["four_b"]).astype(jnp.float32)       # (F, C_out)
    bi = jnp.imag(params["four_b"]).astype(jnp.float32)
    op_season = (jnp.einsum("tf,fs,fio->isto", Ir, Dr, Wr, precision=_HI)
                 - jnp.einsum("tf,fs,fio->isto", Ir, Di, Wi, precision=_HI)
                 + jnp.einsum("tf,fs,fio->isto", Ii, Dr, Wi, precision=_HI)
                 + jnp.einsum("tf,fs,fio->isto", Ii, Di, Wr, precision=_HI))
    bias_season = (jnp.einsum("tf,fo->to", Ir, br, precision=_HI)
                   + jnp.einsum("tf,fo->to", Ii, bi, precision=_HI))

    K = C_in * T
    op = jnp.concatenate([op_trend.reshape(K, n_out),
                          op_season.reshape(K, n_out)], axis=1)          # (64, 128)
    bias = jnp.concatenate([bias_trend.reshape(n_out),
                            bias_season.reshape(n_out)])[None, :]        # (1, 128)
    return {"op": op.astype(jnp.float32), "bias": bias.astype(jnp.float32)}


def _fused_kernel(x_ref, m_ref, b_ref, o_ref):
    # Entire forward: one (B, 64) @ (64, 128) f32 MXU matmul + bias add,
    # writing a lane-dense packed (trend | season) slab.
    o_ref[...] = (jnp.dot(x_ref[...], m_ref[...],
                          precision=_HI,
                          preferred_element_type=jnp.float32)
                  + b_ref[...]).astype(o_ref.dtype)


def temp_disentangler_forward(x, folded):
    """x: (B, C_in, T), PyTorch NCW layout (what nn.Conv1d consumes).

    Returns (trend, season), each (B, T, C_out) as in the reference forward.
    """
    B, C_in, T = x.shape
    C_out = COMPONENT_DIMS
    # (i, s) flattening matches the folded operator layout -> no transpose of x.
    x_flat = x.reshape(B, C_in * T).astype(jnp.float32)          # (B, 64)
    P = 2 * T * C_out                                            # 128
    out = pl.pallas_call(
        _fused_kernel,
        out_shape=jax.ShapeDtypeStruct((B, P), jnp.float32),
        # No grid, no BlockSpecs: single invocation, the (tiny) operands live
        # whole in VMEM, one lane-dense output DMA. No per-batch grid steps.
    )(x_flat, folded["op"], folded["bias"])
    out = out.reshape(B, 2, T, C_out)
    trend = out[:, 0]
    season = out[:, 1]                   # repr_dropout is identity at inference
    return trend, season


def reference_forward(x, params):
    """Pure-JAX reference matching the PyTorch semantics, for verification."""
    kernels = KERNELS
    B, C_in, T = x.shape
    x_btc = jnp.transpose(x, (0, 2, 1)).astype(jnp.float32)
    trends = []
    for (w, b), k in zip(zip(params["conv_w"], params["conv_b"]), kernels):
        xpad = jnp.pad(x_btc, ((0, 0), (k - 1, 0), (0, 0)))
        acc = jnp.zeros((B, T, w.shape[0]), jnp.float32)
        for j in range(k):
            acc = acc + jnp.einsum("bti,oi->bto", xpad[:, j:j + T, :], w[:, :, j],
                                   precision=_HI)
        trends.append(acc + b[None, None, :])
    trend = jnp.mean(jnp.stack(trends, 0), axis=0)
    xf = jnp.fft.rfft(x_btc, axis=1)
    of = jnp.einsum("bfi,fio->bfo", xf, params["four_w"], precision=_HI) \
         + params["four_b"][None]
    season = jnp.fft.irfft(of, n=T, axis=1)
    return trend, season


if __name__ == "__main__":
    key = jax.random.PRNGKey(0)
    ks = jax.random.split(key, 8)

    B, C_in, T = 2, INPUT_DIMS, LENGTH
    C_out = COMPONENT_DIMS
    Freq = T // 2 + 1

    x = jax.random.normal(ks[0], (B, C_in, T), jnp.float32)

    # Deterministic parameter init mirroring the PyTorch shapes:
    # Conv1d weights (C_out, C_in, k) + bias (C_out,); Fourier weight
    # (F, C_in, C_out) complex + bias (F, C_out) complex.
    conv_w, conv_b = [], []
    for i, k in enumerate(KERNELS):
        wkey, bkey = jax.random.split(jax.random.fold_in(ks[1], i))
        bound = 1.0 / np.sqrt(C_in * k)
        conv_w.append(jax.random.uniform(wkey, (C_out, C_in, k), jnp.float32, -bound, bound))
        conv_b.append(jax.random.uniform(bkey, (C_out,), jnp.float32, -bound, bound))

    fb = 1.0 / np.sqrt(C_in)
    four_w = (jax.random.uniform(ks[2], (Freq, C_in, C_out), jnp.float32, -fb, fb)
              + 1j * jax.random.uniform(ks[3], (Freq, C_in, C_out), jnp.float32, -fb, fb))
    four_b = (jax.random.uniform(ks[4], (Freq, C_out), jnp.float32, -fb, fb)
              + 1j * jax.random.uniform(ks[5], (Freq, C_out), jnp.float32, -fb, fb))

    params = {"conv_w": conv_w, "conv_b": conv_b, "four_w": four_w, "four_b": four_b}

    # One-time parameter folding (tiny einsums); the per-step forward is then
    # a single fused pallas_call.
    folded = fold_params(params)

    fwd = jax.jit(temp_disentangler_forward)
    trend, season = jax.block_until_ready(fwd(x, folded))

    trend_ref, season_ref = reference_forward(x, params)
    np.testing.assert_allclose(np.asarray(trend), np.asarray(trend_ref),
                               rtol=1e-4, atol=1e-5)
    np.testing.assert_allclose(np.asarray(season), np.asarray(season_ref),
                               rtol=1e-4, atol=1e-5)
    assert trend.shape == (B, T, C_out) and season.shape == (B, T, C_out)

    print("KERNEL_OK")
</pallas_src>

<mosaic_0001>
module attributes {stable_mosaic.version = 11 : i64} {
  func.func @_fused_kernel(%arg0: memref<2x64xf32, #tpu.memory_space<vmem>>, %arg1: memref<64x128xf32, #tpu.memory_space<vmem>>, %arg2: memref<1x128xf32, #tpu.memory_space<vmem>>, %arg3: memref<2x128xf32, #tpu.memory_space<vmem>>) attributes {dimension_semantics = [], scalar_prefetch = 0 : i64, scratch_operands = 0 : i64, tpu.core_type = #tpu.core_type<tc>} {
    %c0 = arith.constant 0 : index
    %c0_0 = arith.constant 0 : index
    %0 = vector.load %arg0[%c0, %c0_0] : memref<2x64xf32, #tpu.memory_space<vmem>>, vector<2x64xf32>
    %c0_1 = arith.constant 0 : index
    %c0_2 = arith.constant 0 : index
    %1 = vector.load %arg1[%c0_1, %c0_2] : memref<64x128xf32, #tpu.memory_space<vmem>>, vector<64x128xf32>
    %cst = arith.constant dense<0.000000e+00> : vector<2x128xf32>
    %2 = tpu.matmul %0, %1, %cst {dimension_numbers = #tpu.dot_dimension_numbers<[1], [0], [0], [1], [0, 0, 1, 1], [], []>, precision = #tpu.contract_precision<fp32>} : vector<2x64xf32>, vector<64x128xf32>, vector<2x128xf32> -> vector<2x128xf32>
    %c0_3 = arith.constant 0 : index
    %c0_4 = arith.constant 0 : index
    %3 = vector.load %arg2[%c0_3, %c0_4] : memref<1x128xf32, #tpu.memory_space<vmem>>, vector<1x128xf32>
    %4 = vector.broadcast %3 : vector<1x128xf32> to vector<2x128xf32>
    %5 = arith.addf %2, %4 : vector<2x128xf32>
    %c0_5 = arith.constant 0 : index
    %c0_6 = arith.constant 0 : index
    %6 = vector.load %arg3[%c0_5, %c0_6] : memref<2x128xf32, #tpu.memory_space<vmem>>, vector<2x128xf32>
    tpu.vector_store %arg3[%c0_5, %c0_6], %5 {strides = array<i32>} : memref<2x128xf32, #tpu.memory_space<vmem>>, vector<2x128xf32>,
    return
  }
}

</mosaic_0001>

<bundles_post_ra>
// kernel: temp_disentangler_forward.1
= control target key start
LH: loop header
LB: loop body
LE: loop exit
PB: predicated region body
PF: predicated region fallthrough
CT: control target
= control target key end

     0   :  { %8 = vsyncpa [#allocation3], 0  ;;  %s872_s12 = smov [#allocation2]   ;;  %s1026_s0 = inlined_call_operand.vmem [shape: f32[2,64], index: 0, kind: input, shape index: {}]   ;;  %s1027_s1 = inlined_call_operand.hbm [shape: f32[64,128], index: 1, kind: input, shape index: {}]   ;;  %s1028_s2 = inlined_call_operand.vmem [shape: f32[1,128], index: 2, kind: input, shape index: {}]   ;;  %s1029_s3 = inlined_call_operand.vmem [shape: f32[2,128], index: 3, kind: output, shape index: {}]  }
   0x1   :  { %s16_s13 = sshll.u32 %s872_s12, 4  ;;  %s848_s16 = scalar_lea.hbm %s1027_s1, 1024  ;;  %s17_s13 = int_to_ptr.vmem [resolvable:$true] %s16_s13 }
   0x2   :  { %p849_p0 = scmp.ne.s32.totalorder %s1027_s1, %s848_s16  ;;  %p852_p1 = scmp.lt.u32.totalorder %s848_s16, %s1027_s1 }
   0x4   :  { %p854_p2 = pnand %p852_p1, %p849_p0 }
   0x6   :  { %857 = shalt.err (!%p854_p2)
}
   0x7   :  { %s858_s21 = scalar_lea.vmem %s17_s13, 1024  ;;  %p863_p4 = scmp.lt.s32.totalorder %s17_s13, %s17_s13 }
   0x8   :  { %p859_p3 = scmp.ne.s32.totalorder %s17_s13, %s858_s21  ;;  %p864_p5 = scmp.lt.s32.totalorder %s858_s21, %s858_s21 }
   0xa   :  { %p865_p6 = por %p864_p5, %p863_p4 }
   0xc   :  { %p866_p7 = pnand %p865_p6, %p859_p3 }
   0xe   :  { %869 = shalt.err (!%p866_p7)
}
   0xf   :  { %s873_s22 = smov 128   ;;  %s874_s23 = smov 8  }
  0x10   :  { %22 = dma.hbm_to_vmem [thread:$0]  %s1027_s1, 1024, %s17_s13, [#allocation3], %s873_s22, %s873_s22, %s874_s23  }
  0x11   :  { %870 = dma.done.wait [#allocation3], 1024  }
  0x12   :  { %871 = vsyncadd [#allocation3], 4294966272  ;;  %v875_v0 = vmov 0.0|0.0   ;;  %vm876_vm0 = vmmov 0   ;;  %v877_v1 = vmov 0.0   ;;  %v29_v2 = vld [vmem:[#allocation2] sm:$0xff] }
  0x13   :  { %760 = vmatprep.subr.bf16.mxu1 %v875_v0  ;;  %796 = vmatprep.subr.bf16.mxu0 %v875_v0  ;;  %v30_v3 = vld [vmem:[#allocation2 + $0x8] sm:$0xff]  ;;  %v31_v4 = vld [vmem:[#allocation2 + $0x10] sm:$0xff]  ;;  %v49_v5 = vand.u32 4294901760, %v29_v2  ;;  %v32_v7 = vld [vmem:[#allocation2 + $0x18] sm:$0xff]  ;;  %vm44_vm1 = vcmask 523264  }
  0x14   :  { %662 = vmatprep.mubr.msk.f32.mxu1 %vm876_vm0, %v877_v1  ;;  %719 = vmatprep.mubr.msk.f32.mxu0 %vm876_vm0, %v877_v1  ;;  %v52_v6 = vand.u32 4294901760, %v30_v3  ;;  %v55_v8 = vand.u32 4294901760, %v31_v4  ;;  %v33_v9 = vld [vmem:[#allocation2 + $0x20] sm:$0xff]  ;;  %v34_v10 = vld [vmem:[#allocation2 + $0x28] sm:$0xff]  ;;  %v58_v11 = vand.u32 4294901760, %v32_v7  ;;  %v35_v20 = vld [vmem:[#allocation2 + $0x30] sm:$0xff] }
  0x15   :  { %v61_v12 = vand.u32 4294901760, %v33_v9  ;;  %v918_v14 = vsub.f32 %v29_v2, %v49_v5  ;;  %v64_v16 = vand.u32 4294901760, %v34_v10  ;;  %v28_v17 = vld [vmem:[%s1026_s0] sm:$0x3]  ;;  %v36_v21 = vld [vmem:[#allocation2 + $0x38] sm:$0xff]  ;;  %v67_v28 = vand.u32 4294901760, %v35_v20 }
  0x16   :  { %v916_v13 = vpack.c.bf16 %v52_v6, %v49_v5  ;;  %v920_v15 = vsub.f32 %v30_v3, %v52_v6  ;;  %v925_v18 = vsub.f32 %v31_v4, %v55_v8  ;;  %v927_v19 = vsub.f32 %v32_v7, %v58_v11 }
  0x17   :  { %v931_v22 = vpack.c.bf16 %v58_v11, %v55_v8  ;;  %v46_v23 = vsel %vm44_vm1, %v28_v17, 0  ;;  %v134_v25 = vand.u32 4294901760, %v918_v14  ;;  %v939_v27 = vpack.c.bf16 %v64_v16, %v61_v12 }
  0x18   :  { %762 = vmatpush3.bf16.msra.mxu1 %v916_v13  ;;  %798 = vmatpush3.bf16.msra.mxu0 %v916_v13  ;;  %v935_v24 = vand.u32 4294901760, %v46_v23  ;;  %v141_v26 = vand.u32 4294901760, %v920_v15  ;;  %v70_v29 = vand.u32 4294901760, %v36_v21  ;;  %v941_v30 = vsub.f32 %v33_v9, %v61_v12 }
  0x19   :  { %763 = vmatprep.subr.bf16.mxu1 %v875_v0  ;;  %799 = vmatprep.subr.bf16.mxu0 %v875_v0  ;;  %v148_v32 = vand.u32 4294901760, %v925_v18  ;;  %v155_v33 = vand.u32 4294901760, %v927_v19  ;;  %v950_v34 = vsub.f32 %v34_v10, %v64_v16  ;;  %v135_v35 = vsub.f32 %v918_v14, %v134_v25 }
  0x1a   :  { %v944_v31 = vsub.f32 %v46_v23, %v935_v24  ;;  %v142_v36 = vsub.f32 %v920_v15, %v141_v26  ;;  %v957_v38 = vpack.c.bf16 %v70_v29, %v67_v28  ;;  %v959_v39 = vsub.f32 %v35_v20, %v67_v28 }
  0x1b   :  { %v149_v41 = vsub.f32 %v925_v18, %v148_v32  ;;  %v156_v42 = vsub.f32 %v927_v19, %v155_v33  ;;  %v162_v43 = vand.u32 4294901760, %v941_v30  ;;  %v967_v44 = vsub.f32 %v36_v21, %v70_v29 }
  0x1c   :  { %765 = vmatpush3.bf16.msra.mxu1 %v931_v22  ;;  %801 = vmatpush3.bf16.msra.mxu0 %v931_v22  ;;  %v123_v37 = vand.u32 4294901760, %v944_v31  ;;  %v136_v45 = vand.u32 4294901760, %v135_v35  ;;  %v143_v46 = vand.u32 4294901760, %v142_v36  ;;  %v169_v47 = vand.u32 4294901760, %v950_v34 }
  0x1d   :  { %766 = vmatprep.subr.bf16.mxu1 %v875_v0  ;;  %802 = vmatprep.subr.bf16.mxu0 %v875_v0  ;;  %v809_v48 = vpack.c.bf16 %v141_v26, %v134_v25  ;;  %v150_v50 = vand.u32 4294901760, %v149_v41  ;;  %v157_v51 = vand.u32 4294901760, %v156_v42  ;;  %v163_v52 = vsub.f32 %v941_v30, %v162_v43 }
  0x1e   :  { %v124_v40 = vsub.f32 %v944_v31, %v123_v37  ;;  %v773_v53 = vpack.c.bf16 %v143_v46, %v136_v45  ;;  %v170_v54 = vsub.f32 %v950_v34, %v169_v47  ;;  %v176_v55 = vand.u32 4294901760, %v959_v39 }
  0x1f   :  { %v183_v56 = vand.u32 4294901760, %v967_v44  ;;  %v776_v57 = vpack.c.bf16 %v157_v51, %v150_v50  ;;  %v812_v58 = vpack.c.bf16 %v155_v33, %v148_v32  ;;  %v164_v59 = vand.u32 4294901760, %v163_v52 }
  0x20   :  { %768 = vmatpush3.bf16.msra.mxu1 %v939_v27  ;;  %804 = vmatpush3.bf16.msra.mxu0 %v939_v27  ;;  %v125_v49 = vand.u32 4294901760, %v124_v40  ;;  %v171_v60 = vand.u32 4294901760, %v170_v54  ;;  %v177_v61 = vsub.f32 %v959_v39, %v176_v55  ;;  %v815_v2 = vpack.c.bf16 %v169_v47, %v162_v43 }
  0x21   :  { %769 = vmatprep.subr.bf16.mxu1 %v875_v0  ;;  %805 = vmatprep.subr.bf16.mxu0 %v875_v0  ;;  %v184_v62 = vsub.f32 %v967_v44, %v183_v56  ;;  %v818_v6 = vpack.c.bf16 %v183_v56, %v176_v55  ;;  %v785_v7 = vpack.c.bf16 %v920_v15, %v918_v14 }
  0x22   :  { %v779_v63 = vpack.c.bf16 %v171_v60, %v164_v59  ;;  %v178_v3 = vand.u32 4294901760, %v177_v61  ;;  %v788_v8 = vpack.c.bf16 %v927_v19, %v925_v18  ;;  %v791_v9 = vpack.c.bf16 %v950_v34, %v941_v30 }
  0x23   :  { %v185_v4 = vand.u32 4294901760, %v184_v62  ;;  %v794_v10 = vpack.c.bf16 %v967_v44, %v959_v39 }
  0x24   :  { %771 = vmatpush3.bf16.msra.mxu1 %v957_v38  ;;  %807 = vmatpush3.bf16.msra.mxu0 %v957_v38 }
  0x25   :  { %772 = vmatprep.subr.bf16.mxu1 %v875_v0  ;;  %808 = vmatprep.subr.bf16.mxu0 %v875_v0  ;;  %v782_v5 = vpack.c.bf16 %v185_v4, %v178_v3 }
  0x27   :  { %663 = vmatmul.mubr.f32.vlgmr.msra.gmra.mrb[0].mxu1 %v125_v49  ;;  %720 = vmatmul.mubr.f32.vlgmr.msra.gmra.mrb[0].mxu0 %v123_v37 }
  0x28   :  { %774 = vmatpush3.bf16.msra.mxu1 %v773_v53  ;;  %810 = vmatpush3.bf16.msra.mxu0 %v809_v48 }
  0x29   :  { %775 = vmatprep.subr.bf16.mxu1 %v875_v0  ;;  %811 = vmatprep.subr.bf16.mxu0 %v875_v0 }
  0x2a   :  { %681 = vmatprep.mubr.msk.f32.mxu1 %vm876_vm0, %v877_v1  ;;  %738 = vmatprep.mubr.msk.f32.mxu0 %vm876_vm0, %v877_v1 }
  0x2c   :  { %777 = vmatpush3.bf16.msra.mxu1 %v776_v57  ;;  %813 = vmatpush3.bf16.msra.mxu0 %v812_v58 }
  0x2d   :  { %778 = vmatprep.subr.bf16.mxu1 %v875_v0  ;;  %814 = vmatprep.subr.bf16.mxu0 %v875_v0 }
  0x30   :  { %780 = vmatpush3.bf16.msra.mxu1 %v779_v63  ;;  %816 = vmatpush3.bf16.msra.mxu0 %v815_v2 }
  0x31   :  { %781 = vmatprep.subr.bf16.mxu1 %v875_v0  ;;  %817 = vmatprep.subr.bf16.mxu0 %v875_v0 }
  0x34   :  { %783 = vmatpush3.bf16.msra.mxu1 %v782_v5  ;;  %819 = vmatpush3.bf16.msra.mxu0 %v818_v6 }
  0x35   :  { %784 = vmatprep.subr.bf16.mxu1 %v875_v0  ;;  %820 = vmatprep.subr.bf16.mxu0 %v875_v0 }
  0x37   :  { %682 = vmatmul.mubr.f32.vlgmr.msra.gmra.mrb[0].mxu1 %v935_v24  ;;  %739 = vmatmul.mubr.f32.vlgmr.msra.gmra.mrb[0].mxu0 %v935_v24 }
  0x38   :  { %786 = vmatpush3.bf16.msra.mxu1 %v785_v7  ;;  %822 = vmatpush3.bf16.msra.mxu0 %v916_v13 }
  0x39   :  { %787 = vmatprep.subr.bf16.mxu1 %v875_v0  ;;  %823 = vmatprep.subr.bf16.mxu0 %v875_v0 }
  0x3a   :  { %700 = vmatprep.mubr.msk.f32.mxu1 %vm876_vm0, %v877_v1  ;;  %757 = vmatprep.mubr.msk.f32.mxu0 %vm876_vm0, %v877_v1  ;;  %v591_v1 = vld [vmem:[%s1028_s2] ss:$0 sm:$0xff] }
  0x3c   :  { %789 = vmatpush3.bf16.msra.mxu1 %v788_v8  ;;  %825 = vmatpush3.bf16.msra.mxu0 %v931_v22 }
  0x3d   :  { %790 = vmatprep.subr.bf16.mxu1 %v875_v0  ;;  %826 = vmatprep.subr.bf16.mxu0 %v875_v0 }
  0x40   :  { %792 = vmatpush3.bf16.msra.mxu1 %v791_v9  ;;  %828 = vmatpush3.bf16.msra.mxu0 %v939_v27 }
  0x41   :  { %793 = vmatprep.subr.bf16.mxu1 %v875_v0  ;;  %829 = vmatprep.subr.bf16.mxu0 %v875_v0 }
  0x44   :  { %795 = vmatpush3.bf16.msra.mxu1 %v794_v10  ;;  %831 = vmatpush3.bf16.msra.mxu0 %v957_v38 }
  0x47   :  { %701 = vmatmul.mubr.f32.vlgmr.msra.gmra.mrb[0].mxu1 %v944_v31  ;;  %758 = vmatmul.mubr.f32.vlgmr.msra.gmra.mrb[0].mxu0 %v935_v24 }
 0x11a   :  { %v326_v11 = vpop.f32.mrb[0].mxu1  ;;  %v581_v12 = vpop.f32.mrb[0].mxu0 }
 0x11b   :  { %v832_v13 = vadd.f32 %v591_v1, %v326_v11  ;;  %v702_v14 = vpop.f32.mrb[1].mxu1  ;;  %v759_v15 = vpop.f32.mrb[1].mxu0 }
 0x11d   :  { %v833_v16 = vadd.f32 %v832_v13, %v581_v12 }
 0x11f   :  { %585 = vst [vmem:[%s1029_s3] sm:$0x3] %v833_v16 }
 0x120   :  { %590 = vsyncpa [#allocation3], 1 }

</bundles_post_ra>
